<compile_context>
chip_gen: v5e
topology: v5e:2x2
jax: 0.10.0
libtpu: 0.0.40
codegen_flags: <defaults>
</compile_context>

<pallas_src>
import numpy as np
import jax
import jax.numpy as jnp
from jax.experimental import pallas as pl
from jax.experimental.pallas import tpu as pltpu

AA = 'ARNDCQEGHILKMFPSTWYV'
_AA_ASCII = tuple(ord(a) for a in AA)   # trace-time constants; no table input

SUBLANE = 8          # pad batch to a multiple of 8 (fills vreg sublanes)
LANE = 128           # pad sequence axis to a multiple of 128 (lane-dense stores)
MAX_LANE_TILE = 1024 # grid tile along the lane axis for large max_len


def _round_up(x: int, m: int) -> int:
    return ((x + m - 1) // m) * m


def seq_embed_kernel(codes_ref, len_ref, out_ref):
    # codes_ref : VMEM (B, T) int32 -- ASCII codes for this lane tile (0 in padding)
    # len_ref   : VMEM (B, 1) int32 -- per-row valid length = min(len(seq), max_len)
    # out_ref   : VMEM (B, T) int32
    B, T = out_ref.shape
    j = pl.program_id(0)

    codes = codes_ref[...]                                     # (B, T)

    # Unrolled 20-way compare/select accumulation: pure VPU elementwise on the
    # (B, T) tile; no (V, L) one-hot intermediates, no XLU reduction.
    emb = jnp.zeros((B, T), jnp.int32)
    for i, code in enumerate(_AA_ASCII):
        emb = emb + jnp.where(codes == jnp.int32(code),
                              jnp.int32(i + 1), jnp.int32(0))

    # truncate_and_padd: zero every position >= min(seq_len, max_len).
    pos = jax.lax.broadcasted_iota(jnp.int32, (B, T), 1) + j * T
    out_ref[...] = jnp.where(pos < len_ref[...], emb, 0)


def sequence_int_embedding_batch(seqs, max_len=None) -> jax.Array:
    """Batched Pallas equivalent of SequenceIntEmbeddingLayer.forward.

    seqs: list of amino-acid strings. Returns int32 array of shape
    (len(seqs), max_len).
    """
    if isinstance(seqs, str):
        seqs = [seqs]
    if max_len is None:
        max_len = max(len(s) for s in seqs)

    B = len(seqs)
    B_pad = max(_round_up(B, SUBLANE), SUBLANE)
    L_pad = max(_round_up(max_len, LANE), LANE)
    lane_tile = min(L_pad, MAX_LANE_TILE)
    grid = (L_pad // lane_tile,)

    # Host-side glue: strings -> zero-padded ASCII code matrix + lengths.
    codes = np.zeros((B_pad, L_pad), dtype=np.int32)
    lens = np.zeros((B_pad, 1), dtype=np.int32)
    for b, s in enumerate(seqs):
        a = np.frombuffer(s.encode('ascii'), dtype=np.uint8).astype(np.int32)
        n = min(len(s), max_len)
        codes[b, :n] = a[:n]
        lens[b, 0] = n

    out = pl.pallas_call(
        seq_embed_kernel,
        out_shape=jax.ShapeDtypeStruct((B_pad, L_pad), jnp.int32),
        grid=grid,
        in_specs=[
            pl.BlockSpec((B_pad, lane_tile), lambda j: (0, j)),   # codes tile
            pl.BlockSpec((B_pad, 1), lambda j: (0, 0)),           # lengths (resident)
        ],
        out_specs=pl.BlockSpec((B_pad, lane_tile), lambda j: (0, j)),
        compiler_params=pltpu.CompilerParams(
            dimension_semantics=("parallel",)),
    )(jnp.asarray(codes), jnp.asarray(lens))

    return out[:B, :max_len]  # drop sublane/lane padding


def sequence_int_embedding(seq: str, max_len=None) -> jax.Array:
    """Single-string convenience wrapper (matches the PyTorch forward)."""
    if max_len is None:
        max_len = len(seq)
    return sequence_int_embedding_batch([seq], max_len)[0]


def _reference(seq: str, max_len: int) -> np.ndarray:
    aa_dict = {aa: i + 1 for i, aa in enumerate(AA)}
    enc = np.array([aa_dict[a] for a in seq], dtype=np.int32)[:max_len]
    out = np.zeros(max_len, dtype=np.int32)
    out[: enc.shape[0]] = enc
    return out


if __name__ == "__main__":
    key = jax.random.PRNGKey(0)
    # Deterministic synthetic amino-acid sequences (batch=2, lengths 12 and 20).
    idx = np.asarray(jax.random.randint(key, (32,), 0, len(AA)))
    seq_a = ''.join(AA[int(i)] for i in idx[:12])   # shorter than max_len -> pad
    seq_b = ''.join(AA[int(i)] for i in idx[12:])   # longer than max_len -> truncate

    # Case 1: batched call, max_len=16 (seq_a padded, seq_b truncated).
    max_len = 16
    out = jax.block_until_ready(sequence_int_embedding_batch([seq_a, seq_b], max_len))
    assert out.dtype == jnp.int32
    assert out.shape == (2, max_len)
    assert np.array_equal(np.asarray(out[0]), _reference(seq_a, max_len)), "batch row 0 mismatch"
    assert np.array_equal(np.asarray(out[1]), _reference(seq_b, max_len)), "batch row 1 mismatch"

    # Case 2: single-string call, truncate (len 12 > max_len 8).
    max_len = 8
    out2 = jax.block_until_ready(sequence_int_embedding(seq_a, max_len))
    assert np.array_equal(np.asarray(out2), _reference(seq_a, max_len)), "truncate case mismatch"

    # Case 3: single-string call, max_len=None (no truncation/padding).
    out3 = jax.block_until_ready(sequence_int_embedding(seq_b))
    assert np.array_equal(np.asarray(out3), _reference(seq_b, len(seq_b))), "max_len=None mismatch"

    print("KERNEL_OK")
</pallas_src>

<mosaic_0001>
module attributes {stable_mosaic.version = 11 : i64} {
  func.func @seq_embed_kernel(%arg0: i32, %arg1: memref<8x128xi32, #tpu.memory_space<vmem>>, %arg2: memref<8x1xi32, #tpu.memory_space<vmem>>, %arg3: memref<8x128xi32, #tpu.memory_space<vmem>>) attributes {dimension_semantics = [#tpu.dimension_semantics<parallel>], iteration_bounds = array<i64: 1>, scalar_prefetch = 0 : i64, scratch_operands = 0 : i64, tpu.core_type = #tpu.core_type<tc>, window_params = [{transform_indices = @transform_0, window_bounds = array<i64: 8, 128>}, {pipeline_mode = #tpu.pipeline_mode<synchronous>, transform_indices = @transform_1, window_bounds = array<i64: 8, 1>}, {transform_indices = @transform_2, window_bounds = array<i64: 8, 128>}]} {
    %c0 = arith.constant 0 : index
    %c0_0 = arith.constant 0 : index
    %0 = vector.load %arg1[%c0, %c0_0] : memref<8x128xi32, #tpu.memory_space<vmem>>, vector<8x128xi32>
    %c0_i32 = arith.constant 0 : i32
    %1 = vector.broadcast %c0_i32 : i32 to vector<8x128xi32>
    %c65_i32 = arith.constant 65 : i32
    %2 = vector.broadcast %c65_i32 : i32 to vector<8x128xi32>
    %3 = arith.cmpi eq, %0, %2 : vector<8x128xi32>
    %c1_i32 = arith.constant 1 : i32
    %c0_i32_1 = arith.constant 0 : i32
    %4 = vector.broadcast %c1_i32 : i32 to vector<8x128xi32>
    %5 = vector.broadcast %c0_i32_1 : i32 to vector<8x128xi32>
    %6 = arith.select %3, %4, %5 : vector<8x128xi1>, vector<8x128xi32>
    %7 = arith.addi %1, %6 : vector<8x128xi32>
    %c82_i32 = arith.constant 82 : i32
    %8 = vector.broadcast %c82_i32 : i32 to vector<8x128xi32>
    %9 = arith.cmpi eq, %0, %8 : vector<8x128xi32>
    %c2_i32 = arith.constant 2 : i32
    %c0_i32_2 = arith.constant 0 : i32
    %10 = vector.broadcast %c2_i32 : i32 to vector<8x128xi32>
    %11 = vector.broadcast %c0_i32_2 : i32 to vector<8x128xi32>
    %12 = arith.select %9, %10, %11 : vector<8x128xi1>, vector<8x128xi32>
    %13 = arith.addi %7, %12 : vector<8x128xi32>
    %c78_i32 = arith.constant 78 : i32
    %14 = vector.broadcast %c78_i32 : i32 to vector<8x128xi32>
    %15 = arith.cmpi eq, %0, %14 : vector<8x128xi32>
    %c3_i32 = arith.constant 3 : i32
    %c0_i32_3 = arith.constant 0 : i32
    %16 = vector.broadcast %c3_i32 : i32 to vector<8x128xi32>
    %17 = vector.broadcast %c0_i32_3 : i32 to vector<8x128xi32>
    %18 = arith.select %15, %16, %17 : vector<8x128xi1>, vector<8x128xi32>
    %19 = arith.addi %13, %18 : vector<8x128xi32>
    %c68_i32 = arith.constant 68 : i32
    %20 = vector.broadcast %c68_i32 : i32 to vector<8x128xi32>
    %21 = arith.cmpi eq, %0, %20 : vector<8x128xi32>
    %c4_i32 = arith.constant 4 : i32
    %c0_i32_4 = arith.constant 0 : i32
    %22 = vector.broadcast %c4_i32 : i32 to vector<8x128xi32>
    %23 = vector.broadcast %c0_i32_4 : i32 to vector<8x128xi32>
    %24 = arith.select %21, %22, %23 : vector<8x128xi1>, vector<8x128xi32>
    %25 = arith.addi %19, %24 : vector<8x128xi32>
    %c67_i32 = arith.constant 67 : i32
    %26 = vector.broadcast %c67_i32 : i32 to vector<8x128xi32>
    %27 = arith.cmpi eq, %0, %26 : vector<8x128xi32>
    %c5_i32 = arith.constant 5 : i32
    %c0_i32_5 = arith.constant 0 : i32
    %28 = vector.broadcast %c5_i32 : i32 to vector<8x128xi32>
    %29 = vector.broadcast %c0_i32_5 : i32 to vector<8x128xi32>
    %30 = arith.select %27, %28, %29 : vector<8x128xi1>, vector<8x128xi32>
    %31 = arith.addi %25, %30 : vector<8x128xi32>
    %c81_i32 = arith.constant 81 : i32
    %32 = vector.broadcast %c81_i32 : i32 to vector<8x128xi32>
    %33 = arith.cmpi eq, %0, %32 : vector<8x128xi32>
    %c6_i32 = arith.constant 6 : i32
    %c0_i32_6 = arith.constant 0 : i32
    %34 = vector.broadcast %c6_i32 : i32 to vector<8x128xi32>
    %35 = vector.broadcast %c0_i32_6 : i32 to vector<8x128xi32>
    %36 = arith.select %33, %34, %35 : vector<8x128xi1>, vector<8x128xi32>
    %37 = arith.addi %31, %36 : vector<8x128xi32>
    %c69_i32 = arith.constant 69 : i32
    %38 = vector.broadcast %c69_i32 : i32 to vector<8x128xi32>
    %39 = arith.cmpi eq, %0, %38 : vector<8x128xi32>
    %c7_i32 = arith.constant 7 : i32
    %c0_i32_7 = arith.constant 0 : i32
    %40 = vector.broadcast %c7_i32 : i32 to vector<8x128xi32>
    %41 = vector.broadcast %c0_i32_7 : i32 to vector<8x128xi32>
    %42 = arith.select %39, %40, %41 : vector<8x128xi1>, vector<8x128xi32>
    %43 = arith.addi %37, %42 : vector<8x128xi32>
    %c71_i32 = arith.constant 71 : i32
    %44 = vector.broadcast %c71_i32 : i32 to vector<8x128xi32>
    %45 = arith.cmpi eq, %0, %44 : vector<8x128xi32>
    %c8_i32 = arith.constant 8 : i32
    %c0_i32_8 = arith.constant 0 : i32
    %46 = vector.broadcast %c8_i32 : i32 to vector<8x128xi32>
    %47 = vector.broadcast %c0_i32_8 : i32 to vector<8x128xi32>
    %48 = arith.select %45, %46, %47 : vector<8x128xi1>, vector<8x128xi32>
    %49 = arith.addi %43, %48 : vector<8x128xi32>
    %c72_i32 = arith.constant 72 : i32
    %50 = vector.broadcast %c72_i32 : i32 to vector<8x128xi32>
    %51 = arith.cmpi eq, %0, %50 : vector<8x128xi32>
    %c9_i32 = arith.constant 9 : i32
    %c0_i32_9 = arith.constant 0 : i32
    %52 = vector.broadcast %c9_i32 : i32 to vector<8x128xi32>
    %53 = vector.broadcast %c0_i32_9 : i32 to vector<8x128xi32>
    %54 = arith.select %51, %52, %53 : vector<8x128xi1>, vector<8x128xi32>
    %55 = arith.addi %49, %54 : vector<8x128xi32>
    %c73_i32 = arith.constant 73 : i32
    %56 = vector.broadcast %c73_i32 : i32 to vector<8x128xi32>
    %57 = arith.cmpi eq, %0, %56 : vector<8x128xi32>
    %c10_i32 = arith.constant 10 : i32
    %c0_i32_10 = arith.constant 0 : i32
    %58 = vector.broadcast %c10_i32 : i32 to vector<8x128xi32>
    %59 = vector.broadcast %c0_i32_10 : i32 to vector<8x128xi32>
    %60 = arith.select %57, %58, %59 : vector<8x128xi1>, vector<8x128xi32>
    %61 = arith.addi %55, %60 : vector<8x128xi32>
    %c76_i32 = arith.constant 76 : i32
    %62 = vector.broadcast %c76_i32 : i32 to vector<8x128xi32>
    %63 = arith.cmpi eq, %0, %62 : vector<8x128xi32>
    %c11_i32 = arith.constant 11 : i32
    %c0_i32_11 = arith.constant 0 : i32
    %64 = vector.broadcast %c11_i32 : i32 to vector<8x128xi32>
    %65 = vector.broadcast %c0_i32_11 : i32 to vector<8x128xi32>
    %66 = arith.select %63, %64, %65 : vector<8x128xi1>, vector<8x128xi32>
    %67 = arith.addi %61, %66 : vector<8x128xi32>
    %c75_i32 = arith.constant 75 : i32
    %68 = vector.broadcast %c75_i32 : i32 to vector<8x128xi32>
    %69 = arith.cmpi eq, %0, %68 : vector<8x128xi32>
    %c12_i32 = arith.constant 12 : i32
    %c0_i32_12 = arith.constant 0 : i32
    %70 = vector.broadcast %c12_i32 : i32 to vector<8x128xi32>
    %71 = vector.broadcast %c0_i32_12 : i32 to vector<8x128xi32>
    %72 = arith.select %69, %70, %71 : vector<8x128xi1>, vector<8x128xi32>
    %73 = arith.addi %67, %72 : vector<8x128xi32>
    %c77_i32 = arith.constant 77 : i32
    %74 = vector.broadcast %c77_i32 : i32 to vector<8x128xi32>
    %75 = arith.cmpi eq, %0, %74 : vector<8x128xi32>
    %c13_i32 = arith.constant 13 : i32
    %c0_i32_13 = arith.constant 0 : i32
    %76 = vector.broadcast %c13_i32 : i32 to vector<8x128xi32>
    %77 = vector.broadcast %c0_i32_13 : i32 to vector<8x128xi32>
    %78 = arith.select %75, %76, %77 : vector<8x128xi1>, vector<8x128xi32>
    %79 = arith.addi %73, %78 : vector<8x128xi32>
    %c70_i32 = arith.constant 70 : i32
    %80 = vector.broadcast %c70_i32 : i32 to vector<8x128xi32>
    %81 = arith.cmpi eq, %0, %80 : vector<8x128xi32>
    %c14_i32 = arith.constant 14 : i32
    %c0_i32_14 = arith.constant 0 : i32
    %82 = vector.broadcast %c14_i32 : i32 to vector<8x128xi32>
    %83 = vector.broadcast %c0_i32_14 : i32 to vector<8x128xi32>
    %84 = arith.select %81, %82, %83 : vector<8x128xi1>, vector<8x128xi32>
    %85 = arith.addi %79, %84 : vector<8x128xi32>
    %c80_i32 = arith.constant 80 : i32
    %86 = vector.broadcast %c80_i32 : i32 to vector<8x128xi32>
    %87 = arith.cmpi eq, %0, %86 : vector<8x128xi32>
    %c15_i32 = arith.constant 15 : i32
    %c0_i32_15 = arith.constant 0 : i32
    %88 = vector.broadcast %c15_i32 : i32 to vector<8x128xi32>
    %89 = vector.broadcast %c0_i32_15 : i32 to vector<8x128xi32>
    %90 = arith.select %87, %88, %89 : vector<8x128xi1>, vector<8x128xi32>
    %91 = arith.addi %85, %90 : vector<8x128xi32>
    %c83_i32 = arith.constant 83 : i32
    %92 = vector.broadcast %c83_i32 : i32 to vector<8x128xi32>
    %93 = arith.cmpi eq, %0, %92 : vector<8x128xi32>
    %c16_i32 = arith.constant 16 : i32
    %c0_i32_16 = arith.constant 0 : i32
    %94 = vector.broadcast %c16_i32 : i32 to vector<8x128xi32>
    %95 = vector.broadcast %c0_i32_16 : i32 to vector<8x128xi32>
    %96 = arith.select %93, %94, %95 : vector<8x128xi1>, vector<8x128xi32>
    %97 = arith.addi %91, %96 : vector<8x128xi32>
    %c84_i32 = arith.constant 84 : i32
    %98 = vector.broadcast %c84_i32 : i32 to vector<8x128xi32>
    %99 = arith.cmpi eq, %0, %98 : vector<8x128xi32>
    %c17_i32 = arith.constant 17 : i32
    %c0_i32_17 = arith.constant 0 : i32
    %100 = vector.broadcast %c17_i32 : i32 to vector<8x128xi32>
    %101 = vector.broadcast %c0_i32_17 : i32 to vector<8x128xi32>
    %102 = arith.select %99, %100, %101 : vector<8x128xi1>, vector<8x128xi32>
    %103 = arith.addi %97, %102 : vector<8x128xi32>
    %c87_i32 = arith.constant 87 : i32
    %104 = vector.broadcast %c87_i32 : i32 to vector<8x128xi32>
    %105 = arith.cmpi eq, %0, %104 : vector<8x128xi32>
    %c18_i32 = arith.constant 18 : i32
    %c0_i32_18 = arith.constant 0 : i32
    %106 = vector.broadcast %c18_i32 : i32 to vector<8x128xi32>
    %107 = vector.broadcast %c0_i32_18 : i32 to vector<8x128xi32>
    %108 = arith.select %105, %106, %107 : vector<8x128xi1>, vector<8x128xi32>
    %109 = arith.addi %103, %108 : vector<8x128xi32>
    %c89_i32 = arith.constant 89 : i32
    %110 = vector.broadcast %c89_i32 : i32 to vector<8x128xi32>
    %111 = arith.cmpi eq, %0, %110 : vector<8x128xi32>
    %c19_i32 = arith.constant 19 : i32
    %c0_i32_19 = arith.constant 0 : i32
    %112 = vector.broadcast %c19_i32 : i32 to vector<8x128xi32>
    %113 = vector.broadcast %c0_i32_19 : i32 to vector<8x128xi32>
    %114 = arith.select %111, %112, %113 : vector<8x128xi1>, vector<8x128xi32>
    %115 = arith.addi %109, %114 : vector<8x128xi32>
    %c86_i32 = arith.constant 86 : i32
    %116 = vector.broadcast %c86_i32 : i32 to vector<8x128xi32>
    %117 = arith.cmpi eq, %0, %116 : vector<8x128xi32>
    %c20_i32 = arith.constant 20 : i32
    %c0_i32_20 = arith.constant 0 : i32
    %118 = vector.broadcast %c20_i32 : i32 to vector<8x128xi32>
    %119 = vector.broadcast %c0_i32_20 : i32 to vector<8x128xi32>
    %120 = arith.select %117, %118, %119 : vector<8x128xi1>, vector<8x128xi32>
    %121 = arith.addi %115, %120 : vector<8x128xi32>
    %122 = tpu.iota {dimensions = array<i32: 1>} : vector<8x128xi32>
    %c128_i32 = arith.constant 128 : i32
    %123 = arith.muli %arg0, %c128_i32 : i32
    %124 = vector.broadcast %123 : i32 to vector<8x128xi32>
    %125 = arith.addi %122, %124 : vector<8x128xi32>
    %c0_21 = arith.constant 0 : index
    %c0_22 = arith.constant 0 : index
    %126 = vector.load %arg2[%c0_21, %c0_22] : memref<8x1xi32, #tpu.memory_space<vmem>>, vector<8x1xi32>
    %127 = vector.broadcast %126 : vector<8x1xi32> to vector<8x128xi32>
    %128 = arith.cmpi slt, %125, %127 : vector<8x128xi32>
    %c0_i32_23 = arith.constant 0 : i32
    %129 = vector.broadcast %c0_i32_23 : i32 to vector<8x128xi32>
    %130 = arith.select %128, %121, %129 : vector<8x128xi1>, vector<8x128xi32>
    %c0_24 = arith.constant 0 : index
    %c0_25 = arith.constant 0 : index
    %131 = vector.load %arg3[%c0_24, %c0_25] : memref<8x128xi32, #tpu.memory_space<vmem>>, vector<8x128xi32>
    tpu.vector_store %arg3[%c0_24, %c0_25], %130 {strides = array<i32>} : memref<8x128xi32, #tpu.memory_space<vmem>>, vector<8x128xi32>,
    return
  }
  func.func @transform_0(%arg0: i32) -> (i32, i32) {
    %c0_i32 = arith.constant 0 : i32
    %c0_i32_0 = arith.constant 0 : i32
    return %c0_i32, %arg0 : i32, i32
  }
  func.func @transform_1(%arg0: i32) -> (i32, i32) {
    %c0_i32 = arith.constant 0 : i32
    %c0_i32_0 = arith.constant 0 : i32
    %c0_i32_1 = arith.constant 0 : i32
    return %c0_i32, %c0_i32_0 : i32, i32
  }
  func.func @transform_2(%arg0: i32) -> (i32, i32) {
    %c0_i32 = arith.constant 0 : i32
    %c0_i32_0 = arith.constant 0 : i32
    return %c0_i32, %arg0 : i32, i32
  }
}

</mosaic_0001>

<bundles_post_ra>
// kernel: tpu_custom_call.1
= control target key start
LH: loop header
LB: loop body
LE: loop exit
PB: predicated region body
PF: predicated region fallthrough
CT: control target
= control target key end

     0   :  { %s155_s0 = inlined_call_operand.vmem [shape: s32[8,128], index: 0, kind: input, shape index: {}]   ;;  %s156_s1 = inlined_call_operand.vmem [shape: s32[8,1], index: 1, kind: input, shape index: {}]   ;;  %s157_s2 = inlined_call_operand.hbm [shape: s32[8,128], index: 2, kind: output, shape index: {}]  }
   0x1   :  { %v77_v0 = vld [vmem:[%s156_s1] sm:$0xff] }
   0x2   :  { %7 = vsyncpa [#allocation3], 0  ;;  %v129_v1 = vmov 0   ;;  %v12_v2 = vld [vmem:[%s155_s0] sm:$0xff]  ;;  %v72_v39 = vlaneseq  ;;  %s130_s0 = smov [#allocation2]   ;;  %s91_s15 = sshll.u32 %s157_s2, 4  ;;  %s92_s15 = int_to_ptr.hbm [resolvable:$true] %s91_s15 }
   0x3   :  { %102 = vset.pattern.permute.xlu0 %v129_v1  ;;  %vm13_vm0 = vcmp.eq.s32.totalorder %v12_v2, 65  ;;  %vm15_vm1 = vcmp.eq.s32.totalorder %v12_v2, 82  ;;  %vm18_vm2 = vcmp.eq.s32.totalorder %v12_v2, 78  ;;  %vm21_vm3 = vcmp.eq.s32.totalorder %v12_v2, 68  ;;  %s89_s1 = sshll.u32 %s130_s0, 4  ;;  %s90_s1 = int_to_ptr.vmem [resolvable:$true] %s89_s1 }
   0x4   :  { %79 = vperm.xlu0 %102, %v77_v0   ;;  %v14_v3 = vsel %vm13_vm0, 1, %v129_v1  ;;  %v16_v4 = vsel %vm15_vm1, 2, %v129_v1  ;;  %v19_v6 = vsel %vm18_vm2, 3, %v129_v1  ;;  %v22_v8 = vsel %vm21_vm3, 4, %v129_v1 }
   0x5   :  { %v17_v5 = vadd.s32 %v16_v4, %v14_v3  ;;  %vm24_vm4 = vcmp.eq.s32.totalorder %v12_v2, 67  ;;  %vm27_vm5 = vcmp.eq.s32.totalorder %v12_v2, 81  ;;  %vm30_vm6 = vcmp.eq.s32.totalorder %v12_v2, 69 }
   0x6   :  { %v25_v10 = vsel %vm24_vm4, 5, %v129_v1  ;;  %v28_v12 = vsel %vm27_vm5, 6, %v129_v1  ;;  %v31_v14 = vsel %vm30_vm6, 7, %v129_v1  ;;  %vm33_vm7 = vcmp.eq.s32.totalorder %v12_v2, 71 }
   0x7   :  { %v20_v7 = vadd.s32 %v19_v6, %v17_v5  ;;  %v34_v16 = vsel %vm33_vm7, 8, %v129_v1  ;;  %vm36_vm8 = vcmp.eq.s32.totalorder %v12_v2, 72  ;;  %vm39_vm9 = vcmp.eq.s32.totalorder %v12_v2, 73 }
   0x8   :  { %v37_v18 = vsel %vm36_vm8, 9, %v129_v1  ;;  %v40_v20 = vsel %vm39_vm9, 10, %v129_v1  ;;  %vm42_vm10 = vcmp.eq.s32.totalorder %v12_v2, 76  ;;  %vm45_vm11 = vcmp.eq.s32.totalorder %v12_v2, 75 }
   0x9   :  { %v23_v9 = vadd.s32 %v22_v8, %v20_v7  ;;  %v43_v22 = vsel %vm42_vm10, 11, %v129_v1  ;;  %v46_v24 = vsel %vm45_vm11, 12, %v129_v1  ;;  %vm48_vm12 = vcmp.eq.s32.totalorder %v12_v2, 77 }
   0xa   :  { %v49_v26 = vsel %vm48_vm12, 13, %v129_v1  ;;  %vm51_vm13 = vcmp.eq.s32.totalorder %v12_v2, 70  ;;  %vm54_vm14 = vcmp.eq.s32.totalorder %v12_v2, 80  ;;  %vm57_vm15 = vcmp.eq.s32.totalorder %v12_v2, 83 }
   0xb   :  { %v26_v11 = vadd.s32 %v25_v10, %v23_v9  ;;  %v52_v28 = vsel %vm51_vm13, 14, %v129_v1  ;;  %v55_v30 = vsel %vm54_vm14, 15, %v129_v1  ;;  %v58_v32 = vsel %vm57_vm15, 16, %v129_v1 }
   0xc   :  { %vm60_vm0 = vcmp.eq.s32.totalorder %v12_v2, 84  ;;  %vm63_vm1 = vcmp.eq.s32.totalorder %v12_v2, 87  ;;  %vm66_vm2 = vcmp.eq.s32.totalorder %v12_v2, 89  ;;  %vm69_vm3 = vcmp.eq.s32.totalorder %v12_v2, 86 }
   0xd   :  { %v29_v13 = vadd.s32 %v28_v12, %v26_v11  ;;  %v61_v34 = vsel %vm60_vm0, 17, %v129_v1  ;;  %v64_v36 = vsel %vm63_vm1, 18, %v129_v1  ;;  %v67_v38 = vsel %vm66_vm2, 19, %v129_v1 }
   0xe   :  { %v70_v41 = vsel %vm69_vm3, 20, %v129_v1  ;;  %v73_v42 = vand.u32 127, %v72_v39 }
   0xf   :  { %v32_v15 = vadd.s32 %v31_v14, %v29_v13 }
  0x11   :  { %v35_v17 = vadd.s32 %v34_v16, %v32_v15 }
  0x13   :  { %v38_v19 = vadd.s32 %v37_v18, %v35_v17 }
  0x15   :  { %v41_v21 = vadd.s32 %v40_v20, %v38_v19 }
  0x17   :  { %v44_v23 = vadd.s32 %v43_v22, %v41_v21 }
  0x19   :  { %v47_v25 = vadd.s32 %v46_v24, %v44_v23 }
  0x1b   :  { %v50_v27 = vadd.s32 %v49_v26, %v47_v25 }
  0x1d   :  { %v53_v29 = vadd.s32 %v52_v28, %v50_v27 }
  0x1f   :  { %v56_v31 = vadd.s32 %v55_v30, %v53_v29 }
  0x21   :  { %v59_v33 = vadd.s32 %v58_v32, %v56_v31 }
  0x23   :  { %v62_v35 = vadd.s32 %v61_v34, %v59_v33 }
  0x25   :  { %v65_v37 = vadd.s32 %v64_v36, %v62_v35 }
  0x27   :  { %v68_v40 = vadd.s32 %v67_v38, %v65_v37 }
  0x29   :  { %v71_v43 = vadd.s32 %v70_v41, %v68_v40 }
  0x76   :  { %v80_v44 = vpop.permute.xlu0 %79 }
  0x77   :  { %vm81_vm4 = vcmp.lt.s32.totalorder %v73_v42, %v80_v44 }
  0x78   :  { %v82_v45 = vsel %vm81_vm4, %v71_v43, 0 }
  0x79   :  { %83 = vst [vmem:[#allocation2] sm:$0xff] %v82_v45 }
  0x7a   :  { %94 = dma.vmem_to_hbm [thread:$0]  %s90_s1, 128, %s92_s15, [#allocation3]  }
  0x7b   :  { %127 = dma.done.wait [#allocation3], 128  }
  0x7c   :  { %128 = vsyncadd [#allocation3], 4294967168 }
  0x7d   :  { %99 = vsyncpa [#allocation3], 1 }

</bundles_post_ra>
